<compile_context>
chip_gen: v5e
topology: v5e:2x2
jax: 0.10.0
libtpu: 0.0.40
codegen_flags: <defaults>
</compile_context>

<pallas_src>
import jax
import jax.numpy as jnp
from jax import lax
from jax.experimental import pallas as pl
from jax.experimental.pallas import tpu as pltpu


def _round_up(n, m):
    return ((n + m - 1) // m) * m


def vadnet_kernel(x_ref, w1_ref, b1_ref, w2_ref, b2_ref, w3_ref, b3_ref, o_ref):
    # Layer 1: Linear(input_dim -> 64) + ReLU.
    # x arrives as f32 (no extra HBM pass in the wrapper); cast to bf16 at the MXU
    # boundary, accumulate in f32, keep bias/ReLU math in f32.
    x = x_ref[...].astype(jnp.bfloat16)
    w1 = w1_ref[...].astype(jnp.bfloat16)
    h1 = jnp.dot(x, w1, preferred_element_type=jnp.float32)
    h1 = jnp.maximum(h1 + b1_ref[...], 0.0)

    # Dropout(0.3): identity in eval / inference mode.
    # TODO(synk): training-mode dropout (pltpu.prng_seed / pltpu.prng_random_bits) not emitted.

    # Layer 2: Linear(64 -> 32) + ReLU. bf16 MXU operands, f32 accumulation.
    h2 = jnp.dot(h1.astype(jnp.bfloat16), w2_ref[...].astype(jnp.bfloat16),
                 preferred_element_type=jnp.float32)
    h2 = jnp.maximum(h2 + b2_ref[...], 0.0)

    # Layer 3: Linear(32 -> 1) + Sigmoid, computed as w3_row @ h2.T (transpose fused into
    # the dot's dimension_numbers, same pattern as q @ k.T) so the logits come out as a
    # lane-dense (1, TB) row — the output store is a full-width vst, not a masked column.
    logits = lax.dot_general(
        w3_ref[...], h2,                       # (1, 32) x (TB, 32) -> (1, TB)
        dimension_numbers=(((1,), (1,)), ((), ())),
        preferred_element_type=jnp.float32,
    ) + b3_ref[0, 0]                           # scalar bias from SMEM
    o_ref[...] = jax.nn.sigmoid(logits)        # exp/recip on the otherwise-idle EUP


def _choose_tile(B, block_b):
    """Batch tile: multiple of 128 (lane-dense output blocks); >=2 tiles once B >= 512
    so the 'parallel' grid axis can feed both v7x TensorCores."""
    b128 = _round_up(B, 128)
    if b128 <= block_b:
        if b128 >= 512:
            return max(128, _round_up(pl.cdiv(B, 2), 128))
        return b128
    return block_b


def vadnet_forward(x, params, *, block_b=2048):
    """x: (B, input_dim) float32. Returns (B, 1) float32 (inference-mode forward)."""
    w1, b1, w2, b2, w3, b3 = params
    B, D = x.shape

    block_b = max(128, _round_up(block_b, 128))
    tb = _choose_tile(B, block_b)
    n_tiles = pl.cdiv(B, tb)

    w3_row = w3.reshape(1, -1)   # (1, 32) row: layer 3 is w3_row @ h2.T inside the kernel
    b3_s = b3.reshape(1, 1)      # scalar bias -> SMEM

    # v5e scoped-VMEM default is 16 MiB; only very large tiles need more headroom.
    vmem_limit = (48 * 1024 * 1024) if tb >= 4096 else None

    out_row = pl.pallas_call(
        vadnet_kernel,
        out_shape=jax.ShapeDtypeStruct((1, n_tiles * tb), jnp.float32),
        grid=(n_tiles,),
        in_specs=[
            # x: batch-tiled; last (overhanging) block is clipped by Pallas, tail rows
            # are garbage but row-independent and sliced off below.
            pl.BlockSpec((tb, D), lambda i: (i, 0)),
            pl.BlockSpec(w1.shape, lambda i: (0, 0)),        # weights/biases: VMEM-resident
            pl.BlockSpec(b1.shape, lambda i: (0, 0)),
            pl.BlockSpec(w2.shape, lambda i: (0, 0)),
            pl.BlockSpec(b2.shape, lambda i: (0, 0)),
            pl.BlockSpec(w3_row.shape, lambda i: (0, 0)),
            pl.BlockSpec(memory_space=pltpu.MemorySpace.SMEM),  # b3 scalar
        ],
        out_specs=pl.BlockSpec((1, tb), lambda i: (0, i)),   # lane-dense output slab
        compiler_params=pltpu.CompilerParams(
            dimension_semantics=("parallel",),               # shard batch tiles across TCs (v7x)
            vmem_limit_bytes=vmem_limit,
        ),
    )(x, w1, b1, w2, b2, w3_row, b3_s)

    return out_row[0, :B].reshape(B, 1)


def init_params(key, input_dim=39):
    """Deterministic synthetic parameter init (matches nn.Linear shapes, stored (in, out))."""
    k1, k2, k3, k4, k5, k6 = jax.random.split(key, 6)
    w1 = jax.random.normal(k1, (input_dim, 64), jnp.float32) * (1.0 / jnp.sqrt(input_dim))
    b1 = jax.random.normal(k2, (1, 64), jnp.float32) * 0.01
    w2 = jax.random.normal(k3, (64, 32), jnp.float32) * (1.0 / jnp.sqrt(64.0))
    b2 = jax.random.normal(k4, (1, 32), jnp.float32) * 0.01
    w3 = jax.random.normal(k5, (32, 1), jnp.float32) * (1.0 / jnp.sqrt(32.0))
    b3 = jax.random.normal(k6, (1, 1), jnp.float32) * 0.01
    return (w1, b1, w2, b2, w3, b3)


def reference_forward(x, params):
    """Pure-JAX reference mirroring the kernel's dtype choices (bf16 MXU operands, f32 math)."""
    w1, b1, w2, b2, w3, b3 = params
    h1 = jnp.dot(x.astype(jnp.bfloat16), w1.astype(jnp.bfloat16),
                 preferred_element_type=jnp.float32)
    h1 = jnp.maximum(h1 + b1, 0.0)
    h2 = jnp.dot(h1.astype(jnp.bfloat16), w2.astype(jnp.bfloat16),
                 preferred_element_type=jnp.float32)
    h2 = jnp.maximum(h2 + b2, 0.0)
    logits = jnp.dot(h2, w3) + b3
    return jax.nn.sigmoid(logits)


if __name__ == "__main__":
    key = jax.random.PRNGKey(0)
    kx, kp, kx2, kx3 = jax.random.split(key, 4)

    input_dim = 39
    params = init_params(kp, input_dim)

    # B=10: single ragged tile (10 valid rows in a 128-row block), lane-dense (1,128) slab.
    x = jax.random.normal(kx, (10, input_dim), jnp.float32)
    out = jax.block_until_ready(vadnet_forward(x, params))
    ref = reference_forward(x, params)
    assert out.shape == (10, 1)
    assert bool(jnp.allclose(out, ref, atol=2e-3, rtol=2e-3)), "mismatch (single ragged tile)"

    # B=300, block_b=128: 3 batch tiles (2 full + 1 ragged), multi-tile output slab.
    x2 = jax.random.normal(kx2, (300, input_dim), jnp.float32)
    out2 = jax.block_until_ready(vadnet_forward(x2, params, block_b=128))
    ref2 = reference_forward(x2, params)
    assert out2.shape == (300, 1)
    assert bool(jnp.allclose(out2, ref2, atol=2e-3, rtol=2e-3)), "mismatch (multi tile)"

    # B=600, default block_b: exercises the >=2-tile split path (feeds both v7x TCs).
    x3 = jax.random.normal(kx3, (600, input_dim), jnp.float32)
    out3 = jax.block_until_ready(vadnet_forward(x3, params))
    ref3 = reference_forward(x3, params)
    assert out3.shape == (600, 1)
    assert bool(jnp.allclose(out3, ref3, atol=2e-3, rtol=2e-3)), "mismatch (split tiles)"

    print("KERNEL_OK")
</pallas_src>

<mosaic_0001>
module attributes {stable_mosaic.version = 11 : i64} {
  func.func @vadnet_kernel(%arg0: i32, %arg1: memref<128x39xf32, #tpu.memory_space<vmem>>, %arg2: memref<39x64xf32, #tpu.memory_space<vmem>>, %arg3: memref<1x64xf32, #tpu.memory_space<vmem>>, %arg4: memref<64x32xf32, #tpu.memory_space<vmem>>, %arg5: memref<1x32xf32, #tpu.memory_space<vmem>>, %arg6: memref<1x32xf32, #tpu.memory_space<vmem>>, %arg7: memref<1x1xf32, #tpu.memory_space<smem>>, %arg8: memref<1x128xf32, #tpu.memory_space<vmem>>) attributes {dimension_semantics = [#tpu.dimension_semantics<parallel>], iteration_bounds = array<i64: 1>, scalar_prefetch = 0 : i64, scratch_operands = 0 : i64, tpu.core_type = #tpu.core_type<tc>, window_params = [{transform_indices = @transform_0, window_bounds = array<i64: 128, 39>}, {pipeline_mode = #tpu.pipeline_mode<synchronous>, transform_indices = @transform_1, window_bounds = array<i64: 39, 64>}, {pipeline_mode = #tpu.pipeline_mode<synchronous>, transform_indices = @transform_2, window_bounds = array<i64: 1, 64>}, {pipeline_mode = #tpu.pipeline_mode<synchronous>, transform_indices = @transform_3, window_bounds = array<i64: 64, 32>}, {pipeline_mode = #tpu.pipeline_mode<synchronous>, transform_indices = @transform_4, window_bounds = array<i64: 1, 32>}, {pipeline_mode = #tpu.pipeline_mode<synchronous>, transform_indices = @transform_5, window_bounds = array<i64: 1, 32>}, {transform_indices = @transform_6, window_bounds = array<i64: 1, 1>}, {transform_indices = @transform_7, window_bounds = array<i64: 1, 128>}]} {
    %c0 = arith.constant 0 : index
    %c0_0 = arith.constant 0 : index
    %0 = vector.load %arg1[%c0, %c0_0] : memref<128x39xf32, #tpu.memory_space<vmem>>, vector<128x39xf32>
    %1 = arith.truncf %0 : vector<128x39xf32> to vector<128x39xbf16>
    %c0_1 = arith.constant 0 : index
    %c0_2 = arith.constant 0 : index
    %2 = vector.load %arg2[%c0_1, %c0_2] : memref<39x64xf32, #tpu.memory_space<vmem>>, vector<39x64xf32>
    %3 = arith.truncf %2 : vector<39x64xf32> to vector<39x64xbf16>
    %cst = arith.constant dense<0.000000e+00> : vector<128x64xf32>
    %4 = tpu.matmul %1, %3, %cst {dimension_numbers = #tpu.dot_dimension_numbers<[1], [0], [0], [1], [0, 0, 1, 1], [], []>} : vector<128x39xbf16>, vector<39x64xbf16>, vector<128x64xf32> -> vector<128x64xf32>
    %c0_3 = arith.constant 0 : index
    %c0_4 = arith.constant 0 : index
    %5 = vector.load %arg3[%c0_3, %c0_4] : memref<1x64xf32, #tpu.memory_space<vmem>>, vector<1x64xf32>
    %6 = vector.broadcast %5 : vector<1x64xf32> to vector<128x64xf32>
    %7 = arith.addf %4, %6 : vector<128x64xf32>
    %cst_5 = arith.constant 0.000000e+00 : f32
    %8 = vector.broadcast %cst_5 : f32 to vector<128x64xf32>
    %9 = arith.maximumf %7, %8 : vector<128x64xf32>
    %10 = arith.truncf %9 : vector<128x64xf32> to vector<128x64xbf16>
    %c0_6 = arith.constant 0 : index
    %c0_7 = arith.constant 0 : index
    %11 = vector.load %arg4[%c0_6, %c0_7] : memref<64x32xf32, #tpu.memory_space<vmem>>, vector<64x32xf32>
    %12 = arith.truncf %11 : vector<64x32xf32> to vector<64x32xbf16>
    %cst_8 = arith.constant dense<0.000000e+00> : vector<128x32xf32>
    %13 = tpu.matmul %10, %12, %cst_8 {dimension_numbers = #tpu.dot_dimension_numbers<[1], [0], [0], [1], [0, 0, 1, 1], [], []>} : vector<128x64xbf16>, vector<64x32xbf16>, vector<128x32xf32> -> vector<128x32xf32>
    %c0_9 = arith.constant 0 : index
    %c0_10 = arith.constant 0 : index
    %14 = vector.load %arg5[%c0_9, %c0_10] : memref<1x32xf32, #tpu.memory_space<vmem>>, vector<1x32xf32>
    %15 = vector.broadcast %14 : vector<1x32xf32> to vector<128x32xf32>
    %16 = arith.addf %13, %15 : vector<128x32xf32>
    %cst_11 = arith.constant 0.000000e+00 : f32
    %17 = vector.broadcast %cst_11 : f32 to vector<128x32xf32>
    %18 = arith.maximumf %16, %17 : vector<128x32xf32>
    %c0_12 = arith.constant 0 : index
    %c0_13 = arith.constant 0 : index
    %19 = vector.load %arg6[%c0_12, %c0_13] : memref<1x32xf32, #tpu.memory_space<vmem>>, vector<1x32xf32>
    %cst_14 = arith.constant dense<0.000000e+00> : vector<1x128xf32>
    %20 = tpu.matmul %19, %18, %cst_14 {dimension_numbers = #tpu.dot_dimension_numbers<[1], [1], [0], [0], [0, 0, 1, 0], [], []>} : vector<1x32xf32>, vector<128x32xf32>, vector<1x128xf32> -> vector<1x128xf32>
    %c0_15 = arith.constant 0 : index
    %c0_16 = arith.constant 0 : index
    %21 = memref.load %arg7[%c0_15, %c0_16] : memref<1x1xf32, #tpu.memory_space<smem>>
    %22 = vector.broadcast %21 : f32 to vector<1x128xf32>
    %23 = arith.addf %20, %22 : vector<1x128xf32>
    %24 = arith.negf %23 : vector<1x128xf32>
    %25 = math.exp %24 : vector<1x128xf32>
    %cst_17 = arith.constant 1.000000e+00 : f32
    %26 = vector.broadcast %cst_17 : f32 to vector<1x128xf32>
    %27 = arith.addf %26, %25 : vector<1x128xf32>
    %28 = arith.divf %26, %27 : vector<1x128xf32>
    %c0_18 = arith.constant 0 : index
    %c0_19 = arith.constant 0 : index
    %29 = vector.load %arg8[%c0_18, %c0_19] : memref<1x128xf32, #tpu.memory_space<vmem>>, vector<1x128xf32>
    tpu.vector_store %arg8[%c0_18, %c0_19], %28 {strides = array<i32>} : memref<1x128xf32, #tpu.memory_space<vmem>>, vector<1x128xf32>,
    return
  }
  func.func @transform_0(%arg0: i32) -> (i32, i32) {
    %c0_i32 = arith.constant 0 : i32
    %c0_i32_0 = arith.constant 0 : i32
    return %arg0, %c0_i32 : i32, i32
  }
  func.func @transform_1(%arg0: i32) -> (i32, i32) {
    %c0_i32 = arith.constant 0 : i32
    %c0_i32_0 = arith.constant 0 : i32
    %c0_i32_1 = arith.constant 0 : i32
    return %c0_i32, %c0_i32_0 : i32, i32
  }
  func.func @transform_2(%arg0: i32) -> (i32, i32) {
    %c0_i32 = arith.constant 0 : i32
    %c0_i32_0 = arith.constant 0 : i32
    %c0_i32_1 = arith.constant 0 : i32
    return %c0_i32, %c0_i32_0 : i32, i32
  }
  func.func @transform_3(%arg0: i32) -> (i32, i32) {
    %c0_i32 = arith.constant 0 : i32
    %c0_i32_0 = arith.constant 0 : i32
    %c0_i32_1 = arith.constant 0 : i32
    return %c0_i32, %c0_i32_0 : i32, i32
  }
  func.func @transform_4(%arg0: i32) -> (i32, i32) {
    %c0_i32 = arith.constant 0 : i32
    %c0_i32_0 = arith.constant 0 : i32
    %c0_i32_1 = arith.constant 0 : i32
    return %c0_i32, %c0_i32_0 : i32, i32
  }
  func.func @transform_5(%arg0: i32) -> (i32, i32) {
    %c0_i32 = arith.constant 0 : i32
    %c0_i32_0 = arith.constant 0 : i32
    %c0_i32_1 = arith.constant 0 : i32
    return %c0_i32, %c0_i32_0 : i32, i32
  }
  func.func @transform_6(%arg0: i32) -> (i32, i32) {
    %c0_i32 = arith.constant 0 : i32
    %c0_i32_0 = arith.constant 0 : i32
    %c0_i32_1 = arith.constant 0 : i32
    return %c0_i32, %c0_i32_0 : i32, i32
  }
  func.func @transform_7(%arg0: i32) -> (i32, i32) {
    %c0_i32 = arith.constant 0 : i32
    %c0_i32_0 = arith.constant 0 : i32
    return %c0_i32, %arg0 : i32, i32
  }
}

</mosaic_0001>

<bundles_post_ra>
// kernel: tpu_custom_call.1
= control target key start
LH: loop header
LB: loop body
LE: loop exit
PB: predicated region body
PF: predicated region fallthrough
CT: control target
= control target key end

     0   :  { %vm90_vm0 = vcmask 1042432   ;;  %vm91_vm1 = vcmask 1043456   ;;  %v462_v2 = vmov 65535   ;;  %s639_s0 = inlined_call_operand.vmem [shape: f32[10,39], index: 0, kind: input, shape index: {}]   ;;  %s640_s1 = inlined_call_operand.vmem [shape: f32[39,64], index: 1, kind: input, shape index: {}]   ;;  %s641_s2 = inlined_call_operand.vmem [shape: f32[1,64], index: 2, kind: input, shape index: {}]   ;;  %s642_s3 = inlined_call_operand.vmem [shape: f32[64,32], index: 3, kind: input, shape index: {}]   ;;  %s643_s4 = inlined_call_operand.vmem [shape: f32[1,32], index: 4, kind: input, shape index: {}]   ;;  %s644_s5 = inlined_call_operand.vmem [shape: f32[1,32], index: 5, kind: input, shape index: {}]   ;;  %s645_s6 = inlined_call_operand.<no memory space> [shape: f32[1,1], index: 6, kind: input, shape index: {}]   ;;  %s646_s7 = inlined_call_operand.hbm [shape: f32[1,128], index: 7, kind: output, shape index: {}]  }
   0x1   :  { %v57_v0 = vld [vmem:[%s640_s1 + $0x20] sm:$0x7f]  ;;  %v92_v3 = vsel %vm90_vm0, 4294967295, %v462_v2  ;;  %v55_v5 = vld [vmem:[%s640_s1 + $0x10] sm:$0xff]  ;;  %v56_v6 = vld [vmem:[%s640_s1 + $0x18] sm:$0xff] }
   0x2   :  { %v60_v1 = vpack.c.bf16 %v57_v0, %v57_v0  ;;  %v93_v4 = vsel %vm91_vm1, %v92_v3, 0  ;;  %v59_v8 = vpack.c.bf16 %v56_v6, %v55_v5  ;;  %v53_v9 = vld [vmem:[%s640_s1] sm:$0xff]  ;;  %v54_v10 = vld [vmem:[%s640_s1 + $0x8] sm:$0xff] }
   0x4   :  { %v95_v7 = vand.u32 %v93_v4, %v60_v1 }
   0x6   :  { %102 = vmatpush.bf16.msra.mxu0 %v95_v7  ;;  %421 = vmatpush.bf16.msra.mxu2 %v95_v7 }
   0x7   :  { %13 = vsyncpa [#allocation4], 0  ;;  %v29_v11 = vld [vmem:[%s639_s0] sm:$0xff]  ;;  %v58_v12 = vpack.c.bf16 %v54_v10, %v53_v9  ;;  %v30_v13 = vld [vmem:[%s639_s0 + $0x8] sm:$0xff]  ;;  %vm65_vm2 = vcmask 318464   ;;  %vm186_vm3 = vcmask 523264  }
   0x8   :  { %v39_v14 = vld [vmem:[%s639_s0 + $0x50] sm:$0xff]  ;;  %v40_v15 = vld [vmem:[%s639_s0 + $0x58] sm:$0xff]  ;;  %v45_v16 = vpack.c.bf16 %v30_v13, %v29_v11  ;;  %v41_v20 = vld [vmem:[%s639_s0 + $0x60] sm:$0xff]  ;;  %vm279_vm4 = vcmask 261120  }
   0x9   :  { %v50_v17 = vpack.c.bf16 %v40_v15, %v39_v14  ;;  %v31_v18 = vld [vmem:[%s639_s0 + $0x10] sm:$0xff]  ;;  %v32_v19 = vld [vmem:[%s639_s0 + $0x18] sm:$0xff]  ;;  %v42_v21 = vld [vmem:[%s639_s0 + $0x68] sm:$0xff] }
   0xa   :  { %103 = vmatpush.bf16.msra.mxu0 %v59_v8  ;;  %422 = vmatpush.bf16.msra.mxu2 %v59_v8  ;;  %v46_v22 = vpack.c.bf16 %v32_v19, %v31_v18  ;;  %v51_v23 = vpack.c.bf16 %v42_v21, %v41_v20  ;;  %v33_v24 = vld [vmem:[%s639_s0 + $0x20] sm:$0xff]  ;;  %v34_v25 = vld [vmem:[%s639_s0 + $0x28] sm:$0xff]  ;;  %v43_v26 = vld [vmem:[%s639_s0 + $0x70] sm:$0xff] }
   0xb   :  { %v44_v27 = vld [vmem:[%s639_s0 + $0x78] sm:$0xff]  ;;  %v47_v28 = vpack.c.bf16 %v34_v25, %v33_v24  ;;  %v35_v30 = vld [vmem:[%s639_s0 + $0x30] sm:$0xff]  ;;  %v37_v33 = vld [vmem:[%s639_s0 + $0x40] sm:$0xff] }
   0xc   :  { %v52_v29 = vpack.c.bf16 %v44_v27, %v43_v26  ;;  %v36_v31 = vld [vmem:[%s639_s0 + $0x38] sm:$0xff]  ;;  %v38_v34 = vld [vmem:[%s639_s0 + $0x48] sm:$0xff]  ;;  %v176_v36 = vld [vmem:[%s642_s3 + $0x30] sm:$0xff] }
   0xd   :  { %v48_v32 = vpack.c.bf16 %v36_v31, %v35_v30  ;;  %v49_v35 = vpack.c.bf16 %v38_v34, %v37_v33  ;;  %v177_v37 = vld [vmem:[%s642_s3 + $0x38] sm:$0xff]  ;;  %v174_v39 = vld [vmem:[%s642_s3 + $0x20] sm:$0xff]  ;;  %v175_v40 = vld [vmem:[%s642_s3 + $0x28] sm:$0xff] }
   0xe   :  { %104 = vmatpush.bf16.msra.mxu0 %v58_v12  ;;  %423 = vmatpush.bf16.msra.mxu2 %v58_v12  ;;  %v181_v38 = vpack.c.bf16 %v177_v37, %v176_v36  ;;  %v180_v41 = vpack.c.bf16 %v175_v40, %v174_v39  ;;  %v172_v42 = vld [vmem:[%s642_s3 + $0x10] sm:$0xff]  ;;  %v173_v43 = vld [vmem:[%s642_s3 + $0x18] sm:$0xff]  ;;  %v170_v45 = vld [vmem:[%s642_s3] sm:$0xff] }
   0xf   :  { %v179_v44 = vpack.c.bf16 %v173_v43, %v172_v42  ;;  %v171_v46 = vld [vmem:[%s642_s3 + $0x8] sm:$0xff]  ;;  %v430_v49 = vld [vmem:[%s641_s2] ss:$0 sm:$0xff] }
  0x10   :  { %215 = vmatpush.bf16.msra.mxu1 %v181_v38  ;;  %424 = vmatpush.bf16.msra.mxu3 %v181_v38  ;;  %v178_v47 = vpack.c.bf16 %v171_v46, %v170_v45 }
  0x11   :  { %387 = vmatmul.msk.bf16.vlgmr.msra.gmra.mxu0 %vm65_vm2, %v45_v16  ;;  %392 = vmatmul.msk.bf16.vlgmr.msra.gmra.mxu2 %vm65_vm2, %v50_v17 }
  0x14   :  { %216 = vmatpush.bf16.msra.mxu1 %v180_v41  ;;  %425 = vmatpush.bf16.msra.mxu3 %v180_v41 }
  0x18   :  { %217 = vmatpush.bf16.msra.mxu1 %v179_v44  ;;  %426 = vmatpush.bf16.msra.mxu3 %v179_v44 }
  0x1c   :  { %218 = vmatpush.bf16.msra.mxu1 %v178_v47  ;;  %427 = vmatpush.bf16.msra.mxu3 %v178_v47 }
  0x21   :  { %388 = vmatmul.msk.bf16.gmra.mxu0 %vm65_vm2, %v46_v22  ;;  %393 = vmatmul.msk.bf16.gmra.mxu2 %vm65_vm2, %v51_v23 }
  0x31   :  { %389 = vmatmul.msk.bf16.gmra.mxu0 %vm65_vm2, %v47_v28  ;;  %394 = vmatmul.msk.bf16.gmra.mxu2 %vm65_vm2, %v52_v29 }
  0x41   :  { %390 = vmatmul.msk.bf16.gmra.mxu0 %vm65_vm2, %v48_v32 }
  0x51   :  { %391 = vmatmul.msk.bf16.gmra.mxu0 %vm65_vm2, %v49_v35 }
  0x8e   :  { %v106_v48 = vpop.f32.mrf.mxu0 }
  0x8f   :  { %v107_v51 = vadd.f32 %v430_v49, %v106_v48 }
  0x91   :  { %v146_v54 = vmax.f32 %v107_v51, 0.0 }
  0x94   :  { %v131_v50 = vpop.f32.mrf.mxu2 }
  0x95   :  { %v132_v56 = vadd.f32 %v430_v49, %v131_v50 }
  0x96   :  { %v108_v52 = vpop.f32.mrf.mxu0 }
  0x97   :  { %v109_v53 = vadd.f32 %v430_v49, %v108_v52  ;;  %v156_v61 = vmax.f32 %v132_v56, 0.0 }
  0x99   :  { %v147_v55 = vmax.f32 %v109_v53, 0.0 }
  0x9b   :  { %v162_v57 = vpack.c.bf16 %v147_v55, %v146_v54 }
  0x9c   :  { %v133_v58 = vpop.f32.mrf.mxu2 }
  0x9d   :  { %v134_v59 = vadd.f32 %v430_v49, %v133_v58  ;;  %395 = vmatmul.msk.bf16.vlgmr.msra.gmra.mxu1 %vm186_vm3, %v162_v57 }
  0x9e   :  { %v111_v60 = vpop.f32.mrf.mxu0 }
  0x9f   :  { %v157_v62 = vmax.f32 %v134_v59, 0.0  ;;  %v112_v1 = vadd.f32 %v430_v49, %v111_v60 }
  0xa1   :  { %v167_v63 = vpack.c.bf16 %v157_v62, %v156_v61  ;;  %v148_v4 = vmax.f32 %v112_v1, 0.0 }
  0xa3   :  { %400 = vmatmul.msk.bf16.vlgmr.msra.gmra.mxu3 %vm186_vm3, %v167_v63 }
  0xa4   :  { %v136_v0 = vpop.f32.mrf.mxu2 }
  0xa5   :  { %v137_v6 = vadd.f32 %v430_v49, %v136_v0 }
  0xa6   :  { %v113_v2 = vpop.f32.mrf.mxu0 }
  0xa7   :  { %v114_v3 = vadd.f32 %v430_v49, %v113_v2  ;;  %v158_v11 = vmax.f32 %v137_v6, 0.0 }
  0xa9   :  { %v149_v5 = vmax.f32 %v114_v3, 0.0 }
  0xab   :  { %v163_v7 = vpack.c.bf16 %v149_v5, %v148_v4 }
  0xac   :  { %v138_v8 = vpop.f32.mrf.mxu2 }
  0xad   :  { %v139_v9 = vadd.f32 %v430_v49, %v138_v8  ;;  %396 = vmatmul.msk.bf16.gmra.mxu1 %vm186_vm3, %v163_v7 }
  0xae   :  { %v116_v10 = vpop.f32.mrf.mxu0 }
  0xaf   :  { %v159_v12 = vmax.f32 %v139_v9, 0.0  ;;  %v117_v15 = vadd.f32 %v430_v49, %v116_v10 }
  0xb1   :  { %v168_v13 = vpack.c.bf16 %v159_v12, %v158_v11  ;;  %v150_v18 = vmax.f32 %v117_v15, 0.0 }
  0xb3   :  { %401 = vmatmul.msk.bf16.gmra.mxu3 %vm186_vm3, %v168_v13 }
  0xb4   :  { %v141_v14 = vpop.f32.mrf.mxu2 }
  0xb5   :  { %v142_v20 = vadd.f32 %v430_v49, %v141_v14 }
  0xb6   :  { %v118_v16 = vpop.f32.mrf.mxu0 }
  0xb7   :  { %v119_v17 = vadd.f32 %v430_v49, %v118_v16  ;;  %v160_v25 = vmax.f32 %v142_v20, 0.0 }
  0xb9   :  { %v151_v19 = vmax.f32 %v119_v17, 0.0 }
  0xbb   :  { %v164_v21 = vpack.c.bf16 %v151_v19, %v150_v18 }
  0xbc   :  { %v143_v22 = vpop.f32.mrf.mxu2 }
  0xbd   :  { %v144_v23 = vadd.f32 %v430_v49, %v143_v22  ;;  %397 = vmatmul.msk.bf16.gmra.mxu1 %vm186_vm3, %v164_v21 }
  0xbe   :  { %v121_v24 = vpop.f32.mrf.mxu0 }
  0xbf   :  { %v161_v26 = vmax.f32 %v144_v23, 0.0  ;;  %v122_v28 = vadd.f32 %v430_v49, %v121_v24 }
  0xc1   :  { %v169_v27 = vpack.c.bf16 %v161_v26, %v160_v25  ;;  %v152_v31 = vmax.f32 %v122_v28, 0.0  ;;  %v276_v26 = vld [vmem:[%s644_s5] sm:$0x1]  ;;  %s463_s5 = smov [#allocation3]  }
  0xc2   :  { %s376_s15 = sshll.u32 %s463_s5, 4  ;;  %s377_s15 = int_to_ptr.vmem [resolvable:$true] %s376_s15 }
  0xc3   :  { %402 = vmatmul.msk.bf16.gmra.mxu3 %vm186_vm3, %v169_v27  ;;  %v278_v27 = vstv %s645_s6  ;;  %s378_s6 = sshll.u32 %s646_s7, 4  ;;  %s379_s6 = int_to_ptr.hbm [resolvable:$true] %s378_s6 }
  0xc6   :  { %v123_v29 = vpop.f32.mrf.mxu0 }
  0xc7   :  { %v124_v30 = vadd.f32 %v430_v49, %v123_v29 }
  0xc9   :  { %v153_v32 = vmax.f32 %v124_v30, 0.0 }
  0xcb   :  { %v165_v33 = vpack.c.bf16 %v153_v32, %v152_v31 }
  0xcd   :  { %398 = vmatmul.msk.bf16.gmra.mxu1 %vm186_vm3, %v165_v33 }
  0xce   :  { %v126_v34 = vpop.f32.mrf.mxu0 }
  0xcf   :  { %v127_v35 = vadd.f32 %v430_v49, %v126_v34 }
  0xd1   :  { %v154_v38 = vmax.f32 %v127_v35, 0.0 }
  0xd6   :  { %v128_v36 = vpop.f32.mrf.mxu0 }
  0xd7   :  { %v129_v37 = vadd.f32 %v430_v49, %v128_v36  ;;  %v431_v49 = vld [vmem:[%s643_s4] ss:$0 sm:$0xff] }
  0xd9   :  { %v155_v39 = vmax.f32 %v129_v37, 0.0 }
  0xdb   :  { %v166_v40 = vpack.c.bf16 %v155_v39, %v154_v38 }
  0xdd   :  { %399 = vmatmul.msk.bf16.gmra.mxu1 %vm186_vm3, %v166_v40 }
 0x11a   :  { %v220_v41 = vpop.f32.mrf.mxu1 }
 0x11b   :  { %v221_v23 = vadd.f32 %v431_v49, %v220_v41 }
 0x11d   :  { %v260_v25 = vmax.f32 %v221_v23, 0.0 }
 0x122   :  { %v222_v42 = vpop.f32.mrf.mxu1 }
 0x123   :  { %v223_v21 = vadd.f32 %v431_v49, %v222_v42 }
 0x125   :  { %v261_v24 = vmax.f32 %v223_v21, 0.0 }
 0x126   :  { %v245_v43 = vpop.f32.mrf.mxu3 }
 0x127   :  { %v246_v2 = vadd.f32 %v431_v49, %v245_v43 }
 0x129   :  { %v270_v5 = vmax.f32 %v246_v2, 0.0 }
 0x12a   :  { %v225_v44 = vpop.f32.mrf.mxu1 }
 0x12b   :  { %v226_v19 = vadd.f32 %v431_v49, %v225_v44 }
 0x12d   :  { %v262_v22 = vmax.f32 %v226_v19, 0.0 }
 0x12e   :  { %v247_v45 = vpop.f32.mrf.mxu3 }
 0x12f   :  { %v248_v0 = vadd.f32 %v431_v49, %v247_v45 }
 0x131   :  { %v271_v3 = vmax.f32 %v248_v0, 0.0 }
 0x132   :  { %v227_v46 = vpop.f32.mrf.mxu1 }
 0x133   :  { %v228_v17 = vadd.f32 %v431_v49, %v227_v46 }
 0x135   :  { %v263_v20 = vmax.f32 %v228_v17, 0.0 }
 0x136   :  { %v250_v47 = vpop.f32.mrf.mxu3 }
 0x137   :  { %v251_v61 = vadd.f32 %v431_v49, %v250_v47 }
 0x139   :  { %v272_v1 = vmax.f32 %v251_v61, 0.0 }
 0x13a   :  { %v230_v48 = vpop.f32.mrf.mxu1 }
 0x13b   :  { %v231_v15 = vadd.f32 %v431_v49, %v230_v48 }
 0x13d   :  { %v264_v18 = vmax.f32 %v231_v15, 0.0 }
 0x13e   :  { %v252_v50 = vpop.f32.mrf.mxu3 }
 0x13f   :  { %v253_v59 = vadd.f32 %v431_v49, %v252_v50 }
 0x141   :  { %v273_v62 = vmax.f32 %v253_v59, 0.0 }
 0x142   :  { %v232_v51 = vpop.f32.mrf.mxu1 }
 0x143   :  { %v233_v13 = vadd.f32 %v431_v49, %v232_v51 }
 0x145   :  { %v265_v16 = vmax.f32 %v233_v13, 0.0 }
 0x146   :  { %v255_v52 = vpop.f32.mrf.mxu3 }
 0x147   :  { %v256_v56 = vadd.f32 %v431_v49, %v255_v52 }
 0x149   :  { %v274_v60 = vmax.f32 %v256_v56, 0.0 }
 0x14a   :  { %v235_v53 = vpop.f32.mrf.mxu1 }
 0x14b   :  { %v236_v11 = vadd.f32 %v431_v49, %v235_v53 }
 0x14d   :  { %v266_v14 = vmax.f32 %v236_v11, 0.0 }
 0x14e   :  { %v257_v54 = vpop.f32.mrf.mxu3 }
 0x14f   :  { %v258_v55 = vadd.f32 %v431_v49, %v257_v54 }
 0x151   :  { %v275_v57 = vmax.f32 %v258_v55, 0.0 }
 0x152   :  { %v237_v58 = vpop.f32.mrf.mxu1 }
 0x153   :  { %403 = vmatpush.xpose.msk.msrb.mxu2 %vm279_vm4, %v275_v57  ;;  %v238_v9 = vadd.f32 %v431_v49, %v237_v58 }
 0x155   :  { %v267_v12 = vmax.f32 %v238_v9, 0.0 }
 0x157   :  { %404 = vmatpush.xpose.msk.msrb.mxu2 %vm279_vm4, %v274_v60 }
 0x15a   :  { %v240_v63 = vpop.f32.mrf.mxu1 }
 0x15b   :  { %405 = vmatpush.xpose.msk.msrb.mxu2 %vm279_vm4, %v273_v62  ;;  %v241_v7 = vadd.f32 %v431_v49, %v240_v63 }
 0x15d   :  { %v268_v10 = vmax.f32 %v241_v7, 0.0 }
 0x15f   :  { %406 = vmatpush.xpose.msk.msrb.mxu2 %vm279_vm4, %v272_v1 }
 0x162   :  { %v242_v4 = vpop.f32.mrf.mxu1 }
 0x163   :  { %407 = vmatpush.xpose.msk.msrb.mxu2 %vm279_vm4, %v271_v3  ;;  %v243_v6 = vadd.f32 %v431_v49, %v242_v4 }
 0x165   :  { %v269_v8 = vmax.f32 %v243_v6, 0.0 }
 0x167   :  { %408 = vmatpush.xpose.msk.msrb.mxu2 %vm279_vm4, %v270_v5 }
 0x16b   :  { %409 = vmatpush.xpose.msk.msrb.mxu2 %vm279_vm4, %v269_v8 }
 0x16f   :  { %410 = vmatpush.xpose.msk.msrb.mxu2 %vm279_vm4, %v268_v10 }
 0x173   :  { %411 = vmatpush.xpose.msk.msrb.mxu2 %vm279_vm4, %v267_v12 }
 0x177   :  { %412 = vmatpush.xpose.msk.msrb.mxu2 %vm279_vm4, %v266_v14 }
 0x17b   :  { %413 = vmatpush.xpose.msk.msrb.mxu2 %vm279_vm4, %v265_v16 }
 0x17f   :  { %414 = vmatpush.xpose.msk.msrb.mxu2 %vm279_vm4, %v264_v18 }
 0x183   :  { %415 = vmatpush.xpose.msk.msrb.mxu2 %vm279_vm4, %v263_v20 }
 0x187   :  { %416 = vmatpush.xpose.msk.msrb.mxu2 %vm279_vm4, %v262_v22 }
 0x18b   :  { %417 = vmatpush.xpose.msk.msrb.mxu2 %vm279_vm4, %v261_v24 }
 0x18f   :  { %418 = vmatpush.xpose.msk.msrb.mxu2 %vm279_vm4, %v260_v25 }
 0x192   :  { %419 = vmatmul.msk.f32.vlgmr.msrb.gmra.mxu2 %vm279_vm4, %v276_v26 }
 0x215   :  { %v348_v28 = vpop.f32.mrf.mxu2 }
 0x216   :  { %v349_v29 = vadd.f32 %v348_v28, %v278_v27 }
 0x218   :  { %v420_v30 = vmul.f32 -1.442695, %v349_v29 }
 0x21a   :  { %432 = vpow2.f32 %v420_v30 }
 0x220   :  { %v433_v31 = vpop.eup %432 }
 0x221   :  { %v354_v32 = vadd.f32 1.0, %v433_v31 }
 0x223   :  { %434 = vrcp.f32 %v354_v32  ;;  %v366_v36 = vand.u32 2147483648, %v354_v32  ;;  %v364_v38 = vand.u32 2147483647, %v354_v32  ;;  %vm360_vm6 = vweird.f32 %v354_v32 }
 0x225   :  { %v367_v40 = vor.u32 1.1754944e-38, %v366_v36  ;;  %vm365_vm8 = vcmp.eq.f32.partialorder %v364_v38, 8.507059e+37 }
 0x229   :  { %v435_v33 = vpop.eup %434 }
 0x22a   :  { %v356_v34 = vmul.f32 %v435_v33, %v354_v32  ;;  %vm361_vm5 = vweird.f32 %v435_v33 }
 0x22b   :  { %vm362_vm7 = vmor %vm360_vm6, %vm361_vm5 }
 0x22c   :  { %v357_v35 = vsub.f32 1.0, %v356_v34 }
 0x22e   :  { %v358_v37 = vmul.f32 %v435_v33, %v357_v35 }
 0x230   :  { %v359_v39 = vadd.f32 %v435_v33, %v358_v37 }
 0x232   :  { %v363_v41 = vsel %vm362_vm7, %v435_v33, %v359_v39 }
 0x233   :  { %v368_v42 = vsel %vm365_vm8, %v367_v40, %v363_v41 }
 0x234   :  { %370 = vst [vmem:[#allocation3] sm:$0x1] %v368_v42 }
 0x235   :  { %381 = dma.vmem_to_hbm [thread:$0]  %s377_s15, 16, %s379_s6, [#allocation4]  }
 0x236   :  { %460 = dma.done.wait [#allocation4], 16  }
 0x237   :  { %461 = vsyncadd [#allocation4], 4294967280 }
 0x238   :  { %386 = vsyncpa [#allocation4], 1 }

</bundles_post_ra>
